<compile_context>
chip_gen: v7x
topology: tpu7x:2x2x1
jax: 0.10.0
libtpu: 0.0.40
codegen_flags: <defaults>
</compile_context>

<pallas_src>
import functools

import jax
import jax.numpy as jnp
from jax.experimental import pallas as pl
from jax.experimental.pallas import tpu as pltpu

_EPS = 1e-5      # nn.BatchNorm1d default eps
_SLOPE = 0.01    # nn.LeakyReLU default negative_slope


def _round_up(x, m):
    return (x + m - 1) // m * m


def _vmem_capacity_bytes():
    """Generation-aware VMEM capacity (128 MiB v5e/v6e, 64 MiB/core v7x)."""
    try:
        return int(pltpu.get_tpu_info().vmem_capacity_bytes)
    except Exception:
        return 64 << 20  # conservative default (fits v7x)


def _pass1_vmem_bytes(tb, dim_p, hidden_p, w_buffers):
    w1 = dim_p * hidden_p * 2 * w_buffers       # resident bf16 W1
    x_t = 2 * tb * dim_p * 2                    # double-buffered x tile (bf16)
    h_t = 2 * tb * hidden_p * 2                 # double-buffered h-cache tile (bf16)
    stats = 2 * 2 * hidden_p * 4                # partial sum / sumsq outputs
    tmp = 2 * tb * hidden_p * 4                 # f32 dot result + h*h temporaries
    return w1 + x_t + h_t + stats + tmp


def _pass2_vmem_bytes(tb, hidden_p, proj_p, out_itemsize, w_buffers):
    w2 = hidden_p * proj_p * 2 * w_buffers      # resident bf16 W2
    h_t = 2 * tb * hidden_p * 2                 # double-buffered h tile (bf16)
    o_t = 2 * tb * proj_p * out_itemsize        # double-buffered output tile
    vecs = 2 * (2 * hidden_p + proj_p) * 4      # scale / shift / b2
    tmp = 2 * tb * hidden_p * 4                 # f32 hn / act temporaries
    return w2 + h_t + o_t + vecs + tmp


def _pick_batch_tile(batch, dim_p, hidden_p, proj_p, out_itemsize, vmem_cap):
    budget = int(vmem_cap * 0.7)                # headroom for compiler temps
    b_ceil = max(_round_up(batch, 8), 8)
    cands = [t for t in (1024, 512, 256, 128, 64, 32, 16, 8) if t <= b_ceil] or [8]
    for tb in cands:
        need = max(_pass1_vmem_bytes(tb, dim_p, hidden_p, 1),
                   _pass2_vmem_bytes(tb, hidden_p, proj_p, out_itemsize, 1))
        if need <= budget:
            return tb
    return 8


def _resident_spec(shape, single_buffer):
    """Constant-index (fully resident) operand; single-buffered if supported."""
    index_map = lambda i: (0, 0)
    if single_buffer:
        return pl.BlockSpec(shape, index_map, pipeline_mode=pl.Buffered(1))
    return pl.BlockSpec(shape, index_map)


def _stats_kernel(x_ref, w1_ref, h_ref, psum_ref, psumsq_ref):
    # bf16 matmul on the MXU, f32 accumulation.  Linear1's bias is omitted:
    # it cancels exactly under training-mode BatchNorm.
    h = jnp.dot(x_ref[...], w1_ref[...], preferred_element_type=jnp.float32)
    h_ref[...] = h.astype(h_ref.dtype)                       # bf16 cache -> HBM
    psum_ref[...] = jnp.sum(h, axis=0)[None, None, :]        # per-tile partials
    psumsq_ref[...] = jnp.sum(h * h, axis=0)[None, None, :]


def _apply_kernel(h_ref, scale_ref, shift_ref, w2_ref, b2_ref, o_ref, *, slope):
    # Folded BatchNorm affine (one FMA) -> LeakyReLU -> second bf16 matmul.
    hn = h_ref[...].astype(jnp.float32) * scale_ref[...] + shift_ref[...]
    act = jnp.maximum(hn, slope * hn)                        # LeakyReLU (0<slope<1)
    out = jnp.dot(act.astype(w2_ref.dtype), w2_ref[...],
                  preferred_element_type=jnp.float32)
    o_ref[...] = (out + b2_ref[...]).astype(o_ref.dtype)     # fold b2 into cast


def _mlp_forward_impl(x, w1, gamma, beta, w2, b2, *, batch_tile,
                      single_buffer_weights):
    out_dtype = x.dtype
    B, dim = x.shape
    hidden = w1.shape[1]
    proj = w2.shape[1]

    dim_p = _round_up(dim, 128)
    hidden_p = _round_up(hidden, 128)
    proj_p = _round_up(proj, 128)

    vmem_cap = _vmem_capacity_bytes()
    out_itemsize = jnp.dtype(out_dtype).itemsize
    tb = batch_tile or _pick_batch_tile(B, dim_p, hidden_p, proj_p,
                                        out_itemsize, vmem_cap)
    B_p = _round_up(max(B, tb), tb)
    num_tiles = B_p // tb

    # Pad & cast.  Padded x rows / dim cols and padded hidden / projection
    # channels are zero, contribute 0 to the BN sums and to the output, and
    # are sliced off at the end (true batch size B is used for mean/var).
    xb = jnp.pad(x.astype(jnp.bfloat16), ((0, B_p - B), (0, dim_p - dim)))
    w1b = jnp.pad(w1.astype(jnp.bfloat16),
                  ((0, dim_p - dim), (0, hidden_p - hidden)))
    w2b = jnp.pad(w2.astype(jnp.bfloat16),
                  ((0, hidden_p - hidden), (0, proj_p - proj)))
    gamma_p = jnp.pad(gamma.astype(jnp.float32), ((0, 0), (0, hidden_p - hidden)))
    beta_p = jnp.pad(beta.astype(jnp.float32), ((0, 0), (0, hidden_p - hidden)))
    b2_p = jnp.pad(b2.astype(jnp.float32), ((0, 0), (0, proj_p - proj)))

    wbuf = 1 if single_buffer_weights else 2

    # ---------------- pass 1: h = x @ W1, per-tile BN partial stats ----------
    need1 = _pass1_vmem_bytes(tb, dim_p, hidden_p, wbuf)
    limit1 = int(min(vmem_cap * 0.9, max(2 * need1 + (4 << 20), 32 << 20)))

    h_cache, psum, psumsq = pl.pallas_call(
        _stats_kernel,
        out_shape=(
            jax.ShapeDtypeStruct((B_p, hidden_p), jnp.bfloat16),
            jax.ShapeDtypeStruct((num_tiles, 1, hidden_p), jnp.float32),
            jax.ShapeDtypeStruct((num_tiles, 1, hidden_p), jnp.float32),
        ),
        grid_spec=pltpu.PrefetchScalarGridSpec(
            num_scalar_prefetch=0,
            grid=(num_tiles,),
            in_specs=[
                pl.BlockSpec((tb, dim_p), lambda i: (i, 0)),              # x tile
                _resident_spec((dim_p, hidden_p), single_buffer_weights),  # W1
            ],
            out_specs=(
                pl.BlockSpec((tb, hidden_p), lambda i: (i, 0)),           # h cache
                pl.BlockSpec((1, 1, hidden_p), lambda i: (i, 0, 0)),      # sum
                pl.BlockSpec((1, 1, hidden_p), lambda i: (i, 0, 0)),      # sumsq
            ),
        ),
        compiler_params=pltpu.CompilerParams(
            dimension_semantics=("parallel",),     # no cross-tile carry
            vmem_limit_bytes=limit1,
        ),
    )(xb, w1b)

    # ---------------- fold BN stats (tiny, plain JAX) ------------------------
    inv_n = 1.0 / float(B)                        # true batch, not padded
    mean = jnp.sum(psum[:, 0, :], axis=0, keepdims=True) * inv_n
    var = jnp.maximum(
        jnp.sum(psumsq[:, 0, :], axis=0, keepdims=True) * inv_n - mean * mean, 0.0)
    inv_std = jax.lax.rsqrt(var + _EPS)
    scale = gamma_p * inv_std                     # (1, hidden_p) f32
    shift = beta_p - mean * scale                 # (1, hidden_p) f32

    # ---------------- pass 2: BN affine -> LeakyReLU -> act @ W2 + b2 --------
    need2 = _pass2_vmem_bytes(tb, hidden_p, proj_p, out_itemsize, wbuf)
    limit2 = int(min(vmem_cap * 0.9, max(2 * need2 + (4 << 20), 32 << 20)))

    out_p = pl.pallas_call(
        functools.partial(_apply_kernel, slope=_SLOPE),
        out_shape=jax.ShapeDtypeStruct((B_p, proj_p), out_dtype),
        grid_spec=pltpu.PrefetchScalarGridSpec(
            num_scalar_prefetch=0,
            grid=(num_tiles,),
            in_specs=[
                pl.BlockSpec((tb, hidden_p), lambda i: (i, 0)),            # h tile
                _resident_spec((1, hidden_p), single_buffer_weights),      # scale
                _resident_spec((1, hidden_p), single_buffer_weights),      # shift
                _resident_spec((hidden_p, proj_p), single_buffer_weights),  # W2
                _resident_spec((1, proj_p), single_buffer_weights),        # b2
            ],
            out_specs=pl.BlockSpec((tb, proj_p), lambda i: (i, 0)),
        ),
        compiler_params=pltpu.CompilerParams(
            dimension_semantics=("parallel",),     # megacore-shardable on v7x
            vmem_limit_bytes=limit2,
        ),
    )(h_cache, scale, shift, w2b, b2_p)

    return out_p[:B, :proj]


def mlp_forward(x, w1, b1, gamma, beta, w2, b2, *, batch_tile=None):
    # b1 (Linear1 bias) is intentionally not passed to the kernels: under
    # training-mode BatchNorm it cancels exactly (shift = beta - mean*scale
    # removes it), so the forward values are identical to PyTorch.
    del b1
    try:
        return _mlp_forward_impl(x, w1, gamma, beta, w2, b2,
                                 batch_tile=batch_tile,
                                 single_buffer_weights=True)
    except Exception:
        # Fallback if pipeline_mode=pl.Buffered(1) is rejected by this JAX
        # build: same kernels with default (double-buffered) resident weights.
        return _mlp_forward_impl(x, w1, gamma, beta, w2, b2,
                                 batch_tile=batch_tile,
                                 single_buffer_weights=False)


def init_params(key, dim, hidden, proj):
    """Deterministic PyTorch-style init: U(-1/sqrt(fan_in), 1/sqrt(fan_in))."""
    k1, k2, k3, k4 = jax.random.split(key, 4)
    bound1 = 1.0 / jnp.sqrt(dim)
    bound2 = 1.0 / jnp.sqrt(hidden)
    w1 = jax.random.uniform(k1, (dim, hidden), jnp.float32, -bound1, bound1)
    b1 = jax.random.uniform(k2, (1, hidden), jnp.float32, -bound1, bound1)
    gamma = jnp.ones((1, hidden), jnp.float32)   # BatchNorm1d weight
    beta = jnp.zeros((1, hidden), jnp.float32)   # BatchNorm1d bias
    w2 = jax.random.uniform(k3, (hidden, proj), jnp.float32, -bound2, bound2)
    b2 = jax.random.uniform(k4, (1, proj), jnp.float32, -bound2, bound2)
    return w1, b1, gamma, beta, w2, b2


if __name__ == "__main__":
    # Small, BYOL-consistent shapes: dim -> hidden -> projection_size
    B, DIM, HIDDEN, PROJ = 8, 32, 64, 16

    key = jax.random.PRNGKey(0)
    kx, kp = jax.random.split(key)
    x = jax.random.normal(kx, (B, DIM), jnp.float32)
    params = init_params(kp, DIM, HIDDEN, PROJ)
    w1, b1, gamma, beta, w2, b2 = params

    out = mlp_forward(x, *params)
    jax.block_until_ready(out)
    assert out.shape == (B, PROJ)
    assert out.dtype == x.dtype

    # Mixed-precision reference that mirrors the kernel numerics (bf16 dots,
    # f32 stats, b1 dropped since it cancels) -- tight tolerance.
    xb = x.astype(jnp.bfloat16)
    w1b = w1.astype(jnp.bfloat16)
    w2b = w2.astype(jnp.bfloat16)
    h_m = jnp.dot(xb, w1b, preferred_element_type=jnp.float32)
    mean_m = h_m.mean(axis=0, keepdims=True)
    var_m = (h_m * h_m).mean(axis=0, keepdims=True) - mean_m * mean_m
    hn_m = (h_m - mean_m) * jax.lax.rsqrt(var_m + 1e-5) * gamma + beta
    act_m = jnp.maximum(hn_m, 0.01 * hn_m)
    ref_m = jnp.dot(act_m.astype(jnp.bfloat16), w2b,
                    preferred_element_type=jnp.float32) + b2
    assert jnp.allclose(out, ref_m, atol=2e-2, rtol=2e-2), (
        "mixed-precision ref mismatch, max abs diff "
        + str(float(jnp.max(jnp.abs(out - ref_m)))))

    # Full-f32 PyTorch-equivalent reference (training-mode BN, biased variance,
    # with b1) -- looser tolerance because the kernel runs bf16 matmuls.
    h = x @ w1 + b1
    mean = h.mean(axis=0, keepdims=True)
    var = ((h - mean) ** 2).mean(axis=0, keepdims=True)
    hn = (h - mean) / jnp.sqrt(var + 1e-5) * gamma + beta
    act = jnp.where(hn >= 0, hn, 0.01 * hn)
    ref = act @ w2 + b2
    assert jnp.allclose(out, ref, atol=1e-1, rtol=1e-1), (
        "f32 ref mismatch, max abs diff "
        + str(float(jnp.max(jnp.abs(out - ref)))))

    print("KERNEL_OK")
</pallas_src>

<mosaic_0001>
module attributes {stable_mosaic.version = 11 : i64} {
  func.func @_stats_kernel(%arg0: i32, %arg1: memref<8x128xbf16, #tpu.memory_space<vmem>>, %arg2: memref<128x128xbf16, #tpu.memory_space<vmem>>, %arg3: memref<8x128xbf16, #tpu.memory_space<vmem>>, %arg4: memref<1x1x128xf32, #tpu.memory_space<vmem>>, %arg5: memref<1x1x128xf32, #tpu.memory_space<vmem>>) attributes {dimension_semantics = [#tpu.dimension_semantics<parallel>], iteration_bounds = array<i64: 1>, scalar_prefetch = 0 : i64, scratch_operands = 0 : i64, tpu.core_type = #tpu.core_type<tc>, window_params = [{transform_indices = @transform_0, window_bounds = array<i64: 8, 128>}, {pipeline_mode = #tpu.pipeline_mode<synchronous>, transform_indices = @transform_1, window_bounds = array<i64: 128, 128>}, {transform_indices = @transform_2, window_bounds = array<i64: 8, 128>}, {transform_indices = @transform_3, window_bounds = array<i64: 1, 1, 128>}, {transform_indices = @transform_4, window_bounds = array<i64: 1, 1, 128>}]} {
    %c0 = arith.constant 0 : index
    %c0_0 = arith.constant 0 : index
    %0 = vector.load %arg1[%c0, %c0_0] : memref<8x128xbf16, #tpu.memory_space<vmem>>, vector<8x128xbf16>
    %c0_1 = arith.constant 0 : index
    %c0_2 = arith.constant 0 : index
    %1 = vector.load %arg2[%c0_1, %c0_2] : memref<128x128xbf16, #tpu.memory_space<vmem>>, vector<128x128xbf16>
    %cst = arith.constant dense<0.000000e+00> : vector<8x128xf32>
    %2 = tpu.matmul %0, %1, %cst {dimension_numbers = #tpu.dot_dimension_numbers<[1], [0], [0], [1], [0, 0, 1, 1], [], []>} : vector<8x128xbf16>, vector<128x128xbf16>, vector<8x128xf32> -> vector<8x128xf32>
    %3 = arith.truncf %2 : vector<8x128xf32> to vector<8x128xbf16>
    %c0_3 = arith.constant 0 : index
    %c0_4 = arith.constant 0 : index
    %4 = vector.load %arg3[%c0_3, %c0_4] : memref<8x128xbf16, #tpu.memory_space<vmem>>, vector<8x128xbf16>
    tpu.vector_store %arg3[%c0_3, %c0_4], %3 {strides = array<i32>} : memref<8x128xbf16, #tpu.memory_space<vmem>>, vector<8x128xbf16>,
    %cst_5 = arith.constant dense<0.000000e+00> : vector<128xf32>
    %5 = vector.multi_reduction <add>, %2, %cst_5 [0] : vector<8x128xf32> to vector<128xf32>
    %6 = vector.shape_cast %5 : vector<128xf32> to vector<1x1x128xf32>
    %c0_6 = arith.constant 0 : index
    %c0_7 = arith.constant 0 : index
    %c0_8 = arith.constant 0 : index
    %7 = vector.load %arg4[%c0_6, %c0_7, %c0_8] : memref<1x1x128xf32, #tpu.memory_space<vmem>>, vector<1x1x128xf32>
    tpu.vector_store %arg4[%c0_6, %c0_7, %c0_8], %6 {strides = array<i32>} : memref<1x1x128xf32, #tpu.memory_space<vmem>>, vector<1x1x128xf32>,
    %8 = arith.mulf %2, %2 : vector<8x128xf32>
    %cst_9 = arith.constant dense<0.000000e+00> : vector<128xf32>
    %9 = vector.multi_reduction <add>, %8, %cst_9 [0] : vector<8x128xf32> to vector<128xf32>
    %10 = vector.shape_cast %9 : vector<128xf32> to vector<1x1x128xf32>
    %c0_10 = arith.constant 0 : index
    %c0_11 = arith.constant 0 : index
    %c0_12 = arith.constant 0 : index
    %11 = vector.load %arg5[%c0_10, %c0_11, %c0_12] : memref<1x1x128xf32, #tpu.memory_space<vmem>>, vector<1x1x128xf32>
    tpu.vector_store %arg5[%c0_10, %c0_11, %c0_12], %10 {strides = array<i32>} : memref<1x1x128xf32, #tpu.memory_space<vmem>>, vector<1x1x128xf32>,
    return
  }
  func.func @transform_0(%arg0: i32) -> (i32, i32) {
    %c0_i32 = arith.constant 0 : i32
    %c0_i32_0 = arith.constant 0 : i32
    return %arg0, %c0_i32 : i32, i32
  }
  func.func @transform_1(%arg0: i32) -> (i32, i32) {
    %c0_i32 = arith.constant 0 : i32
    %c0_i32_0 = arith.constant 0 : i32
    %c0_i32_1 = arith.constant 0 : i32
    return %c0_i32, %c0_i32_0 : i32, i32
  }
  func.func @transform_2(%arg0: i32) -> (i32, i32) {
    %c0_i32 = arith.constant 0 : i32
    %c0_i32_0 = arith.constant 0 : i32
    return %arg0, %c0_i32 : i32, i32
  }
  func.func @transform_3(%arg0: i32) -> (i32, i32, i32) {
    %c0_i32 = arith.constant 0 : i32
    %c0_i32_0 = arith.constant 0 : i32
    %c0_i32_1 = arith.constant 0 : i32
    return %arg0, %c0_i32, %c0_i32_0 : i32, i32, i32
  }
  func.func @transform_4(%arg0: i32) -> (i32, i32, i32) {
    %c0_i32 = arith.constant 0 : i32
    %c0_i32_0 = arith.constant 0 : i32
    %c0_i32_1 = arith.constant 0 : i32
    return %arg0, %c0_i32, %c0_i32_0 : i32, i32, i32
  }
}

module attributes {stable_mosaic.version = 11 : i64} {
  func.func @_stats_kernel(%arg0: i32, %arg1: memref<8x128xbf16, #tpu.memory_space<vmem>>, %arg2: memref<128x128xbf16, #tpu.memory_space<vmem>>, %arg3: memref<8x128xbf16, #tpu.memory_space<vmem>>, %arg4: memref<1x1x128xf32, #tpu.memory_space<vmem>>, %arg5: memref<1x1x128xf32, #tpu.memory_space<vmem>>) attributes {dimension_semantics = [#tpu.dimension_semantics<parallel>], iteration_bounds = array<i64: 1>, scalar_prefetch = 0 : i64, scratch_operands = 0 : i64, tpu.core_type = #tpu.core_type<tc>, window_params = [{transform_indices = @transform_0, window_bounds = array<i64: 8, 128>}, {pipeline_mode = #tpu.pipeline_mode<synchronous>, transform_indices = @transform_1, window_bounds = array<i64: 128, 128>}, {transform_indices = @transform_2, window_bounds = array<i64: 8, 128>}, {transform_indices = @transform_3, window_bounds = array<i64: 1, 1, 128>}, {transform_indices = @transform_4, window_bounds = array<i64: 1, 1, 128>}]} {
    %c0 = arith.constant 0 : index
    %c0_0 = arith.constant 0 : index
    %0 = vector.load %arg1[%c0, %c0_0] : memref<8x128xbf16, #tpu.memory_space<vmem>>, vector<8x128xbf16>
    %c0_1 = arith.constant 0 : index
    %c0_2 = arith.constant 0 : index
    %1 = vector.load %arg2[%c0_1, %c0_2] : memref<128x128xbf16, #tpu.memory_space<vmem>>, vector<128x128xbf16>
    %cst = arith.constant dense<0.000000e+00> : vector<8x128xf32>
    %2 = tpu.matmul %0, %1, %cst {dimension_numbers = #tpu.dot_dimension_numbers<[1], [0], [0], [1], [0, 0, 1, 1], [], []>} : vector<8x128xbf16>, vector<128x128xbf16>, vector<8x128xf32> -> vector<8x128xf32>
    %3 = arith.truncf %2 : vector<8x128xf32> to vector<8x128xbf16>
    %c0_3 = arith.constant 0 : index
    %c0_4 = arith.constant 0 : index
    %4 = vector.load %arg3[%c0_3, %c0_4] : memref<8x128xbf16, #tpu.memory_space<vmem>>, vector<8x128xbf16>
    tpu.vector_store %arg3[%c0_3, %c0_4], %3 {strides = array<i32>} : memref<8x128xbf16, #tpu.memory_space<vmem>>, vector<8x128xbf16>,
    %cst_5 = arith.constant dense<0.000000e+00> : vector<128xf32>
    %5 = vector.multi_reduction <add>, %2, %cst_5 [0] : vector<8x128xf32> to vector<128xf32>
    %6 = vector.shape_cast %5 : vector<128xf32> to vector<1x1x128xf32>
    %c0_6 = arith.constant 0 : index
    %c0_7 = arith.constant 0 : index
    %c0_8 = arith.constant 0 : index
    %7 = vector.load %arg4[%c0_6, %c0_7, %c0_8] : memref<1x1x128xf32, #tpu.memory_space<vmem>>, vector<1x1x128xf32>
    tpu.vector_store %arg4[%c0_6, %c0_7, %c0_8], %6 {strides = array<i32>} : memref<1x1x128xf32, #tpu.memory_space<vmem>>, vector<1x1x128xf32>,
    %8 = arith.mulf %2, %2 : vector<8x128xf32>
    %cst_9 = arith.constant dense<0.000000e+00> : vector<128xf32>
    %9 = vector.multi_reduction <add>, %8, %cst_9 [0] : vector<8x128xf32> to vector<128xf32>
    %10 = vector.shape_cast %9 : vector<128xf32> to vector<1x1x128xf32>
    %c0_10 = arith.constant 0 : index
    %c0_11 = arith.constant 0 : index
    %c0_12 = arith.constant 0 : index
    %11 = vector.load %arg5[%c0_10, %c0_11, %c0_12] : memref<1x1x128xf32, #tpu.memory_space<vmem>>, vector<1x1x128xf32>
    tpu.vector_store %arg5[%c0_10, %c0_11, %c0_12], %10 {strides = array<i32>} : memref<1x1x128xf32, #tpu.memory_space<vmem>>, vector<1x1x128xf32>,
    return
  }
  func.func @transform_0(%arg0: i32) -> (i32, i32) {
    %c0_i32 = arith.constant 0 : i32
    %c0_i32_0 = arith.constant 0 : i32
    return %arg0, %c0_i32 : i32, i32
  }
  func.func @transform_1(%arg0: i32) -> (i32, i32) {
    %c0_i32 = arith.constant 0 : i32
    %c0_i32_0 = arith.constant 0 : i32
    %c0_i32_1 = arith.constant 0 : i32
    return %c0_i32, %c0_i32_0 : i32, i32
  }
  func.func @transform_2(%arg0: i32) -> (i32, i32) {
    %c0_i32 = arith.constant 0 : i32
    %c0_i32_0 = arith.constant 0 : i32
    return %arg0, %c0_i32 : i32, i32
  }
  func.func @transform_3(%arg0: i32) -> (i32, i32, i32) {
    %c0_i32 = arith.constant 0 : i32
    %c0_i32_0 = arith.constant 0 : i32
    %c0_i32_1 = arith.constant 0 : i32
    return %arg0, %c0_i32, %c0_i32_0 : i32, i32, i32
  }
  func.func @transform_4(%arg0: i32) -> (i32, i32, i32) {
    %c0_i32 = arith.constant 0 : i32
    %c0_i32_0 = arith.constant 0 : i32
    %c0_i32_1 = arith.constant 0 : i32
    return %arg0, %c0_i32, %c0_i32_0 : i32, i32, i32
  }
}

</mosaic_0001>

<bundles_post_ra>
// kernel: tpu_custom_call.1
= control target key start
LH: loop header
LB: loop body
LE: loop exit
PB: predicated region body
PF: predicated region fallthrough
CT: control target
= control target key end

     0   :  { %10 = vsyncpa [#allocation3], 0  ;;  %s489_s0 = inlined_call_operand.hbm [shape: bf16[8,128], index: 0, kind: input, shape index: {}]   ;;  %s490_s1 = inlined_call_operand.hbm [shape: bf16[128,128], index: 1, kind: input, shape index: {}]   ;;  %s491_s2 = inlined_call_operand.hbm [shape: bf16[8,128], index: 2, kind: output, shape index: {0}]   ;;  %s492_s3 = inlined_call_operand.hbm [shape: f32[1,1,128], index: 3, kind: output, shape index: {1}]   ;;  %s493_s4 = inlined_call_operand.hbm [shape: f32[1,1,128], index: 4, kind: output, shape index: {2}]  }
   0x1   :  { %11 = vsyncpa [#allocation6], 0 }
   0x2   :  { %12 = vsyncpa [#allocation4], 0 }
   0x3   :  { %13 = vsyncpa [#allocation9], 0  ;;  %s380_s15 = smov [#allocation2]   ;;  %s381_s17 = smov [#allocation5]  }
   0x4   :  { %s20_s16 = sshll.u32 %s380_s15, 4  ;;  %s29_s18 = sshll.u32 %s381_s17, 4  ;;  %s21_s16 = int_to_ptr.vmem [resolvable:$true] %s20_s16  ;;  %s414_s18 = int_to_ptr.vmem [resolvable:$true] %s29_s18 }
   0x5   :  { %s262_s21 = scalar_lea.hbm %s489_s0, 64 }
   0x6   :  { %p263_p0 = scmp.ne.s32.totalorder %s489_s0, %s262_s21  ;;  %p266_p1 = scmp.lt.u32.totalorder %s262_s21, %s489_s0 }
   0x8   :  { %p268_p2 = pnand %p266_p1, %p263_p0 }
   0xa   :  { %271 = shalt.err (!%p268_p2)
}
   0xb   :  { %s272_s26 = scalar_lea.vmem %s21_s16, 64  ;;  %p277_p4 = scmp.lt.s32.totalorder %s21_s16, %s21_s16 }
   0xc   :  { %p273_p3 = scmp.ne.s32.totalorder %s21_s16, %s272_s26  ;;  %p278_p5 = scmp.lt.s32.totalorder %s272_s26, %s272_s26 }
   0xe   :  { %p279_p6 = por %p278_p5, %p277_p4 }
  0x10   :  { %p280_p7 = pnand %p279_p6, %p273_p3 }
  0x12   :  { %283 = shalt.err (!%p280_p7)
}
  0x13   :  { %23 = dma.hbm_to_vmem [thread:$0]  %s489_s0, 64, %s21_s16, [#allocation3]  }
  0x14   :  { %s284_s5 = scalar_lea.hbm %s490_s1, 1024 }
  0x15   :  { %p285_p8 = scmp.ne.s32.totalorder %s490_s1, %s284_s5  ;;  %p288_p9 = scmp.lt.u32.totalorder %s284_s5, %s490_s1 }
  0x17   :  { %p290_p10 = pnand %p288_p9, %p285_p8 }
  0x19   :  { %293 = shalt.err (!%p290_p10)
}
  0x1a   :  { %s294_s10 = scalar_lea.vmem %s414_s18, 1024  ;;  %p299_p12 = scmp.lt.s32.totalorder %s414_s18, %s414_s18 }
  0x1b   :  { %p295_p11 = scmp.ne.s32.totalorder %s414_s18, %s294_s10  ;;  %p300_p13 = scmp.lt.s32.totalorder %s294_s10, %s294_s10 }
  0x1d   :  { %p301_p0 = por %p300_p13, %p299_p12 }
  0x1f   :  { %p302_p1 = pnand %p301_p0, %p295_p11 }
  0x21   :  { %305 = shalt.err (!%p302_p1)
}
  0x22   :  { %s382_s0 = smov 64   ;;  %s383_s11 = smov 4  }
  0x23   :  { %35 = dma.hbm_to_vmem [thread:$0]  %s490_s1, 1024, %s414_s18, [#allocation6], %s382_s0, %s382_s0, %s383_s11  }
  0x24   :  { %372 = dma.done.wait [#allocation3], 64  }
  0x25   :  { %373 = vsyncadd [#allocation3], 4294967232 }
  0x26   :  { %374 = dma.done.wait [#allocation6], 1024  }
  0x27   :  { %375 = vsyncadd [#allocation6], 4294966272  ;;  %v384_v0 = vmov 0.0   ;;  %vm385_vm0 = vmmov 0   ;;  %v254_v1 = vld [vmem:[#allocation5] sm:$0xff]   ;;  %v255_v2 = vld [vmem:[#allocation5 + $0x8] sm:$0xff]  }
  0x28   :  { %225 = vmatprep.subr.bf16.mxu0 %v384_v0  ;;  %241 = vmatprep.mubr.msk.bf16.mxu0 %vm385_vm0, %v384_v0  ;;  %v256_v3 = vld [vmem:[#allocation5 + $0x10] sm:$0xff]   ;;  %v257_v4 = vld [vmem:[#allocation5 + $0x18] sm:$0xff]   ;;  %v258_v5 = vld [vmem:[#allocation5 + $0x20] sm:$0xff]   ;;  %s386_s1 = smov [#allocation7]  }
  0x29   :  { %226 = vmatpush3.bf16.msra.mxu0 %v254_v1  ;;  %v259_v6 = vld [vmem:[#allocation5 + $0x28] sm:$0xff]   ;;  %v260_v7 = vld [vmem:[#allocation5 + $0x30] sm:$0xff]   ;;  %v261_v8 = vld [vmem:[#allocation5 + $0x38] sm:$0xff]   ;;  %s171_s14 = sshll.u32 %s386_s1, 4  ;;  %s172_s14 = int_to_ptr.vmem [resolvable:$true] %s171_s14 }
  0x2a   :  { %227 = vmatprep.subr.bf16.mxu0 %v384_v0  ;;  %v43_v9 = vld [vmem:[#allocation2] sm:$0xf]  ;;  %s306_s15 = scalar_lea.vmem %s172_s14, 64  ;;  %p311_p3 = scmp.lt.s32.totalorder %s172_s14, %s172_s14 }
  0x2b   :  { %p307_p2 = scmp.ne.s32.totalorder %s172_s14, %s306_s15  ;;  %p312_p4 = scmp.lt.s32.totalorder %s306_s15, %s306_s15 }
  0x2d   :  { %228 = vmatpush3.bf16.msra.mxu0 %v255_v2  ;;  %p313_p5 = por %p312_p4, %p311_p3 }
  0x2e   :  { %229 = vmatprep.subr.bf16.mxu0 %v384_v0 }
  0x2f   :  { %p314_p6 = pnand %p313_p5, %p307_p2 }
  0x31   :  { %230 = vmatpush3.bf16.msra.mxu0 %v256_v3 }
  0x32   :  { %231 = vmatprep.subr.bf16.mxu0 %v384_v0 }
  0x35   :  { %232 = vmatpush3.bf16.msra.mxu0 %v257_v4 }
  0x36   :  { %233 = vmatprep.subr.bf16.mxu0 %v384_v0 }
  0x39   :  { %234 = vmatpush3.bf16.msra.mxu0 %v258_v5 }
  0x3a   :  { %235 = vmatprep.subr.bf16.mxu0 %v384_v0 }
  0x3d   :  { %236 = vmatpush3.bf16.msra.mxu0 %v259_v6 }
  0x3e   :  { %237 = vmatprep.subr.bf16.mxu0 %v384_v0 }
  0x41   :  { %238 = vmatpush3.bf16.msra.mxu0 %v260_v7 }
  0x42   :  { %239 = vmatprep.subr.bf16.mxu0 %v384_v0 }
  0x45   :  { %240 = vmatpush3.bf16.msra.mxu0 %v261_v8 }
  0x48   :  { %242 = vmatmul.mubr.bf16.vlgmr.msra.gmra.mrb[0].mxu0 %v43_v9 }
 0x11b   :  { %v142_v10 = vpop.f32.mrb[0].mxu0 }
 0x11c   :  { %v150_v11 = vrot.slane %v142_v10, 4  ;;  %v157_v12 = vmul.f32 %v142_v10, %v142_v10  ;;  %v243_v13 = vpop.f32.mrb[1].mxu0  ;;  %v148_v14 = vpack.c.bf16 %v142_v10, %v142_v10 }
 0x11d   :  { %v145_v15 = vpop.f32.mrb[2].mxu0 }
 0x11e   :  { %v151_v16 = vadd.f32 %v150_v11, %v142_v10  ;;  %v158_v17 = vrot.slane %v157_v12, 4  ;;  %v244_v18 = vpop.f32.mrb[3].mxu0  ;;  %149 = vst [vmem:[#allocation7] sm:$0xf] %v148_v14 }
 0x11f   :  { %317 = shalt.err (!%p314_p6)
}
 0x120   :  { %s318_s18 = scalar_lea.hbm %s491_s2, 64 }
 0x121   :  { %p319_p7 = scmp.ne.s32.totalorder %s491_s2, %s318_s18  ;;  %p322_p8 = scmp.lt.u32.totalorder %s318_s18, %s491_s2 }
 0x123   :  { %p324_p9 = pnand %p322_p8, %p319_p7 }
 0x125   :  { %327 = shalt.err (!%p324_p9)
}
 0x126   :  { %174 = dma.vmem_to_hbm [thread:$0]  %s172_s14, 64, %s491_s2, [#allocation4]   ;;  %v159_v19 = vadd.f32 %v158_v17, %v157_v12  ;;  %v152_v20 = vrot.slane %v151_v16, 2 }
 0x127   :  { %s387_s25 = smov [#allocation8]   ;;  %s388_s27 = smov [#allocation10]  }
 0x128   :  { %v153_v21 = vadd.f32 %v152_v20, %v151_v16  ;;  %v160_v22 = vrot.slane %v159_v19, 2  ;;  %s181_s26 = sshll.u32 %s387_s25, 4  ;;  %s191_s28 = sshll.u32 %s388_s27, 4  ;;  %s182_s26 = int_to_ptr.vmem [resolvable:$true] %s181_s26  ;;  %s457_s28 = int_to_ptr.vmem [resolvable:$true] %s191_s28 }
 0x129   :  { %s328_s29 = scalar_lea.vmem %s182_s26, 16  ;;  %s332_s2 = scalar_lea.vmem %s182_s26, 32 }
 0x12a   :  { %v154_v23 = vrot.slane %v153_v21, 1  ;;  %v161_v24 = vadd.f32 %v160_v22, %v159_v19  ;;  %p329_p10 = scmp.ne.s32.totalorder %s182_s26, %s328_s29  ;;  %p333_p11 = scmp.lt.s32.totalorder %s182_s26, %s182_s26 }
 0x12b   :  { %p334_p12 = scmp.lt.s32.totalorder %s332_s2, %s328_s29 }
 0x12c   :  { %v155_v25 = vadd.f32 %v154_v23, %v153_v21  ;;  %v162_v26 = vrot.slane %v161_v24, 1 }
 0x12d   :  { %p335_p13 = por %p334_p12, %p333_p11 }
 0x12e   :  { %156 = vst [vmem:[#allocation8] sm:$0x1] %v155_v25  ;;  %v163_v27 = vadd.f32 %v162_v26, %v161_v24 }
 0x12f   :  { %p336_p0 = pnand %p335_p13, %p329_p10 }
 0x131   :  { %339 = shalt.err (!%p336_p0)
}
 0x132   :  { %s340_s6 = scalar_lea.hbm %s492_s3, 16 }
 0x133   :  { %p341_p1 = scmp.ne.s32.totalorder %s492_s3, %s340_s6  ;;  %p344_p2 = scmp.lt.u32.totalorder %s340_s6, %s492_s3 }
 0x135   :  { %p346_p3 = pnand %p344_p2, %p341_p1 }
 0x137   :  { %349 = shalt.err (!%p346_p3)
}
 0x138   :  { %184 = dma.vmem_to_hbm [thread:$0]  %s182_s26, 16, %s492_s3, [#allocation9]   ;;  %164 = vst [vmem:[#allocation10] sm:$0x1] %v163_v27 }
 0x139   :  { %s350_s12 = scalar_lea.vmem %s457_s28, 16  ;;  %s354_s13 = scalar_lea.vmem %s457_s28, 32 }
 0x13a   :  { %p351_p4 = scmp.ne.s32.totalorder %s457_s28, %s350_s12  ;;  %p355_p5 = scmp.lt.s32.totalorder %s457_s28, %s457_s28 }
 0x13b   :  { %p356_p6 = scmp.lt.s32.totalorder %s354_s13, %s350_s12 }
 0x13d   :  { %p357_p7 = por %p356_p6, %p355_p5 }
 0x13f   :  { %p358_p8 = pnand %p357_p7, %p351_p4 }
 0x141   :  { %361 = shalt.err (!%p358_p8)
}
 0x142   :  { %s362_s15 = scalar_lea.hbm %s493_s4, 16 }
 0x143   :  { %p363_p9 = scmp.ne.s32.totalorder %s493_s4, %s362_s15  ;;  %p366_p10 = scmp.lt.u32.totalorder %s362_s15, %s493_s4 }
 0x145   :  { %p368_p11 = pnand %p366_p10, %p363_p9 }
 0x147   :  { %371 = shalt.err (!%p368_p11)
}
 0x148   :  { %194 = dma.vmem_to_hbm [thread:$0]  %s457_s28, 16, %s493_s4, [#allocation9]  }
 0x149   :  { %376 = dma.done.wait [#allocation4], 64  }
 0x14a   :  { %377 = vsyncadd [#allocation4], 4294967232 }
 0x14b   :  { %378 = dma.done.wait [#allocation9], 32  }
 0x14c   :  { %379 = vsyncadd [#allocation9], 4294967264 }
 0x14d   :  { %204 = vsyncpa [#allocation3], 1 }
 0x14e   :  { %205 = vsyncpa [#allocation6], 1 }
 0x14f   :  { %206 = vsyncpa [#allocation4], 1 }
 0x150   :  { %207 = vsyncpa [#allocation9], 1 }

// kernel: tpu_custom_call.1
= control target key start
LH: loop header
LB: loop body
LE: loop exit
PB: predicated region body
PF: predicated region fallthrough
CT: control target
= control target key end

     0   :  { %10 = vsyncpa [#allocation3], 0  ;;  %s489_s0 = inlined_call_operand.hbm [shape: bf16[8,128], index: 0, kind: input, shape index: {}]   ;;  %s490_s1 = inlined_call_operand.hbm [shape: bf16[128,128], index: 1, kind: input, shape index: {}]   ;;  %s491_s2 = inlined_call_operand.hbm [shape: bf16[8,128], index: 2, kind: output, shape index: {0}]   ;;  %s492_s3 = inlined_call_operand.hbm [shape: f32[1,1,128], index: 3, kind: output, shape index: {1}]   ;;  %s493_s4 = inlined_call_operand.hbm [shape: f32[1,1,128], index: 4, kind: output, shape index: {2}]  }
   0x1   :  { %11 = vsyncpa [#allocation6], 0 }
   0x2   :  { %12 = vsyncpa [#allocation4], 0 }
   0x3   :  { %13 = vsyncpa [#allocation9], 0  ;;  %s380_s15 = smov [#allocation2]   ;;  %s381_s17 = smov [#allocation5]  }
   0x4   :  { %s20_s16 = sshll.u32 %s380_s15, 4  ;;  %s29_s18 = sshll.u32 %s381_s17, 4  ;;  %s21_s16 = int_to_ptr.vmem [resolvable:$true] %s20_s16  ;;  %s414_s18 = int_to_ptr.vmem [resolvable:$true] %s29_s18 }
   0x5   :  { %s262_s21 = scalar_lea.hbm %s489_s0, 64 }
   0x6   :  { %p263_p0 = scmp.ne.s32.totalorder %s489_s0, %s262_s21  ;;  %p266_p1 = scmp.lt.u32.totalorder %s262_s21, %s489_s0 }
   0x8   :  { %p268_p2 = pnand %p266_p1, %p263_p0 }
   0xa   :  { %271 = shalt.err (!%p268_p2)
}
   0xb   :  { %s272_s26 = scalar_lea.vmem %s21_s16, 64  ;;  %p277_p4 = scmp.lt.s32.totalorder %s21_s16, %s21_s16 }
   0xc   :  { %p273_p3 = scmp.ne.s32.totalorder %s21_s16, %s272_s26  ;;  %p278_p5 = scmp.lt.s32.totalorder %s272_s26, %s272_s26 }
   0xe   :  { %p279_p6 = por %p278_p5, %p277_p4 }
  0x10   :  { %p280_p7 = pnand %p279_p6, %p273_p3 }
  0x12   :  { %283 = shalt.err (!%p280_p7)
}
  0x13   :  { %23 = dma.hbm_to_vmem [thread:$0]  %s489_s0, 64, %s21_s16, [#allocation3]  }
  0x14   :  { %s284_s5 = scalar_lea.hbm %s490_s1, 1024 }
  0x15   :  { %p285_p8 = scmp.ne.s32.totalorder %s490_s1, %s284_s5  ;;  %p288_p9 = scmp.lt.u32.totalorder %s284_s5, %s490_s1 }
  0x17   :  { %p290_p10 = pnand %p288_p9, %p285_p8 }
  0x19   :  { %293 = shalt.err (!%p290_p10)
}
  0x1a   :  { %s294_s10 = scalar_lea.vmem %s414_s18, 1024  ;;  %p299_p12 = scmp.lt.s32.totalorder %s414_s18, %s414_s18 }
  0x1b   :  { %p295_p11 = scmp.ne.s32.totalorder %s414_s18, %s294_s10  ;;  %p300_p13 = scmp.lt.s32.totalorder %s294_s10, %s294_s10 }
  0x1d   :  { %p301_p0 = por %p300_p13, %p299_p12 }
  0x1f   :  { %p302_p1 = pnand %p301_p0, %p295_p11 }
  0x21   :  { %305 = shalt.err (!%p302_p1)
}
  0x22   :  { %s382_s0 = smov 64   ;;  %s383_s11 = smov 4  }
  0x23   :  { %35 = dma.hbm_to_vmem [thread:$0]  %s490_s1, 1024, %s414_s18, [#allocation6], %s382_s0, %s382_s0, %s383_s11  }
  0x24   :  { %372 = dma.done.wait [#allocation3], 64  }
  0x25   :  { %373 = vsyncadd [#allocation3], 4294967232 }
  0x26   :  { %374 = dma.done.wait [#allocation6], 1024  }
  0x27   :  { %375 = vsyncadd [#allocation6], 4294966272  ;;  %v384_v0 = vmov 0.0   ;;  %vm385_vm0 = vmmov 0   ;;  %v254_v1 = vld [vmem:[#allocation5] sm:$0xff]   ;;  %v255_v2 = vld [vmem:[#allocation5 + $0x8] sm:$0xff]  }
  0x28   :  { %225 = vmatprep.subr.bf16.mxu0 %v384_v0  ;;  %241 = vmatprep.mubr.msk.bf16.mxu0 %vm385_vm0, %v384_v0  ;;  %v256_v3 = vld [vmem:[#allocation5 + $0x10] sm:$0xff]   ;;  %v257_v4 = vld [vmem:[#allocation5 + $0x18] sm:$0xff]   ;;  %v258_v5 = vld [vmem:[#allocation5 + $0x20] sm:$0xff]   ;;  %s386_s1 = smov [#allocation7]  }
  0x29   :  { %226 = vmatpush3.bf16.msra.mxu0 %v254_v1  ;;  %v259_v6 = vld [vmem:[#allocation5 + $0x28] sm:$0xff]   ;;  %v260_v7 = vld [vmem:[#allocation5 + $0x30] sm:$0xff]   ;;  %v261_v8 = vld [vmem:[#allocation5 + $0x38] sm:$0xff]   ;;  %s171_s14 = sshll.u32 %s386_s1, 4  ;;  %s172_s14 = int_to_ptr.vmem [resolvable:$true] %s171_s14 }
  0x2a   :  { %227 = vmatprep.subr.bf16.mxu0 %v384_v0  ;;  %v43_v9 = vld [vmem:[#allocation2] sm:$0xf]  ;;  %s306_s15 = scalar_lea.vmem %s172_s14, 64  ;;  %p311_p3 = scmp.lt.s32.totalorder %s172_s14, %s172_s14 }
  0x2b   :  { %p307_p2 = scmp.ne.s32.totalorder %s172_s14, %s306_s15  ;;  %p312_p4 = scmp.lt.s32.totalorder %s306_s15, %s306_s15 }
  0x2d   :  { %228 = vmatpush3.bf16.msra.mxu0 %v255_v2  ;;  %p313_p5 = por %p312_p4, %p311_p3 }
  0x2e   :  { %229 = vmatprep.subr.bf16.mxu0 %v384_v0 }
  0x2f   :  { %p314_p6 = pnand %p313_p5, %p307_p2 }
  0x31   :  { %230 = vmatpush3.bf16.msra.mxu0 %v256_v3 }
  0x32   :  { %231 = vmatprep.subr.bf16.mxu0 %v384_v0 }
  0x35   :  { %232 = vmatpush3.bf16.msra.mxu0 %v257_v4 }
  0x36   :  { %233 = vmatprep.subr.bf16.mxu0 %v384_v0 }
  0x39   :  { %234 = vmatpush3.bf16.msra.mxu0 %v258_v5 }
  0x3a   :  { %235 = vmatprep.subr.bf16.mxu0 %v384_v0 }
  0x3d   :  { %236 = vmatpush3.bf16.msra.mxu0 %v259_v6 }
  0x3e   :  { %237 = vmatprep.subr.bf16.mxu0 %v384_v0 }
  0x41   :  { %238 = vmatpush3.bf16.msra.mxu0 %v260_v7 }
  0x42   :  { %239 = vmatprep.subr.bf16.mxu0 %v384_v0 }
  0x45   :  { %240 = vmatpush3.bf16.msra.mxu0 %v261_v8 }
  0x48   :  { %242 = vmatmul.mubr.bf16.vlgmr.msra.gmra.mrb[0].mxu0 %v43_v9 }
 0x11b   :  { %v142_v10 = vpop.f32.mrb[0].mxu0 }
 0x11c   :  { %v150_v11 = vrot.slane %v142_v10, 4  ;;  %v157_v12 = vmul.f32 %v142_v10, %v142_v10  ;;  %v243_v13 = vpop.f32.mrb[1].mxu0  ;;  %v148_v14 = vpack.c.bf16 %v142_v10, %v142_v10 }
 0x11d   :  { %v145_v15 = vpop.f32.mrb[2].mxu0 }
 0x11e   :  { %v151_v16 = vadd.f32 %v150_v11, %v142_v10  ;;  %v158_v17 = vrot.slane %v157_v12, 4  ;;  %v244_v18 = vpop.f32.mrb[3].mxu0  ;;  %149 = vst [vmem:[#allocation7] sm:$0xf] %v148_v14 }
 0x11f   :  { %317 = shalt.err (!%p314_p6)
}
 0x120   :  { %s318_s18 = scalar_lea.hbm %s491_s2, 64 }
 0x121   :  { %p319_p7 = scmp.ne.s32.totalorder %s491_s2, %s318_s18  ;;  %p322_p8 = scmp.lt.u32.totalorder %s318_s18, %s491_s2 }
 0x123   :  { %p324_p9 = pnand %p322_p8, %p319_p7 }
 0x125   :  { %327 = shalt.err (!%p324_p9)
}
 0x126   :  { %174 = dma.vmem_to_hbm [thread:$0]  %s172_s14, 64, %s491_s2, [#allocation4]   ;;  %v159_v19 = vadd.f32 %v158_v17, %v157_v12  ;;  %v152_v20 = vrot.slane %v151_v16, 2 }
 0x127   :  { %s387_s25 = smov [#allocation8]   ;;  %s388_s27 = smov [#allocation10]  }
 0x128   :  { %v153_v21 = vadd.f32 %v152_v20, %v151_v16  ;;  %v160_v22 = vrot.slane %v159_v19, 2  ;;  %s181_s26 = sshll.u32 %s387_s25, 4  ;;  %s191_s28 = sshll.u32 %s388_s27, 4  ;;  %s182_s26 = int_to_ptr.vmem [resolvable:$true] %s181_s26  ;;  %s457_s28 = int_to_ptr.vmem [resolvable:$true] %s191_s28 }
 0x129   :  { %s328_s29 = scalar_lea.vmem %s182_s26, 16  ;;  %s332_s2 = scalar_lea.vmem %s182_s26, 32 }
 0x12a   :  { %v154_v23 = vrot.slane %v153_v21, 1  ;;  %v161_v24 = vadd.f32 %v160_v22, %v159_v19  ;;  %p329_p10 = scmp.ne.s32.totalorder %s182_s26, %s328_s29  ;;  %p333_p11 = scmp.lt.s32.totalorder %s182_s26, %s182_s26 }
 0x12b   :  { %p334_p12 = scmp.lt.s32.totalorder %s332_s2, %s328_s29 }
 0x12c   :  { %v155_v25 = vadd.f32 %v154_v23, %v153_v21  ;;  %v162_v26 = vrot.slane %v161_v24, 1 }
 0x12d   :  { %p335_p13 = por %p334_p12, %p333_p11 }
 0x12e   :  { %156 = vst [vmem:[#allocation8] sm:$0x1] %v155_v25  ;;  %v163_v27 = vadd.f32 %v162_v26, %v161_v24 }
 0x12f   :  { %p336_p0 = pnand %p335_p13, %p329_p10 }
 0x131   :  { %339 = shalt.err (!%p336_p0)
}
 0x132   :  { %s340_s6 = scalar_lea.hbm %s492_s3, 16 }
 0x133   :  { %p341_p1 = scmp.ne.s32.totalorder %s492_s3, %s340_s6  ;;  %p344_p2 = scmp.lt.u32.totalorder %s340_s6, %s492_s3 }
 0x135   :  { %p346_p3 = pnand %p344_p2, %p341_p1 }
 0x137   :  { %349 = shalt.err (!%p346_p3)
}
 0x138   :  { %184 = dma.vmem_to_hbm [thread:$0]  %s182_s26, 16, %s492_s3, [#allocation9]   ;;  %164 = vst [vmem:[#allocation10] sm:$0x1] %v163_v27 }
 0x139   :  { %s350_s12 = scalar_lea.vmem %s457_s28, 16  ;;  %s354_s13 = scalar_lea.vmem %s457_s28, 32 }
 0x13a   :  { %p351_p4 = scmp.ne.s32.totalorder %s457_s28, %s350_s12  ;;  %p355_p5 = scmp.lt.s32.totalorder %s457_s28, %s457_s28 }
 0x13b   :  { %p356_p6 = scmp.lt.s32.totalorder %s354_s13, %s350_s12 }
 0x13d   :  { %p357_p7 = por %p356_p6, %p355_p5 }
 0x13f   :  { %p358_p8 = pnand %p357_p7, %p351_p4 }
 0x141   :  { %361 = shalt.err (!%p358_p8)
}
 0x142   :  { %s362_s15 = scalar_lea.hbm %s493_s4, 16 }
 0x143   :  { %p363_p9 = scmp.ne.s32.totalorder %s493_s4, %s362_s15  ;;  %p366_p10 = scmp.lt.u32.totalorder %s362_s15, %s493_s4 }
 0x145   :  { %p368_p11 = pnand %p366_p10, %p363_p9 }
 0x147   :  { %371 = shalt.err (!%p368_p11)
}
 0x148   :  { %194 = dma.vmem_to_hbm [thread:$0]  %s457_s28, 16, %s493_s4, [#allocation9]  }
 0x149   :  { %376 = dma.done.wait [#allocation4], 64  }
 0x14a   :  { %377 = vsyncadd [#allocation4], 4294967232 }
 0x14b   :  { %378 = dma.done.wait [#allocation9], 32  }
 0x14c   :  { %379 = vsyncadd [#allocation9], 4294967264 }
 0x14d   :  { %204 = vsyncpa [#allocation3], 1 }
 0x14e   :  { %205 = vsyncpa [#allocation6], 1 }
 0x14f   :  { %206 = vsyncpa [#allocation4], 1 }
 0x150   :  { %207 = vsyncpa [#allocation9], 1 }

</bundles_post_ra>
